<compile_context>
chip_gen: v7x
topology: tpu7x:2x2x1
jax: 0.10.0
libtpu: 0.0.40
codegen_flags: <defaults>
</compile_context>

<pallas_src>
import jax
import jax.numpy as jnp
from jax.experimental import pallas as pl
from jax.experimental.pallas import tpu as pltpu  # noqa: F401  (kept for parity)

# Model hyper-parameters (small, consistent with the module's __init__).
EMBED = 32                    # embed_size
HEADS = 4                     # heads (unused at runtime: attention is degenerate)
HEAD_DIM = EMBED // HEADS
FWD_EXP = 4                   # forward_expansion
FFN_HIDDEN = EMBED * FWD_EXP  # 128 — already lane-dense
SEQ = 8
BATCH = 2
EPS = 1e-5                    # nn.LayerNorm default eps

EP = 128                      # padded (lane-dense) embedding width
T = BATCH * SEQ               # total tokens per call


def transformer_block_kernel(q_ref, v_ref, pool_ref, wfc_ref, w1_ref, w2_ref,
                             vec_ref, out_ref):
    q = q_ref[...]            # (T, EP), cols >= EMBED are zero
    v = v_ref[...]            # (T, EP), cols >= EMBED are zero

    vecs = vec_ref[...]       # (8, EP) packed small params
    b1, b2 = vecs[0:1, :], vecs[1:2, :]
    g1, be1 = vecs[2:3, :], vecs[3:4, :]
    g2, be2 = vecs[4:5, :], vecs[5:6, :]
    lane_mask = vecs[6:7, :]  # 1.0 on the real EMBED columns, 0.0 on the padding

    # ---- SelfAttention (degenerate, see header comment) ----
    # pool is block-diagonal: pool[i, j] = 1 iff tokens i and j belong to the
    # same batch element, so pool @ v == per-batch column-sum of V broadcast
    # over the query positions — exactly the reference einsum's result
    # (softmax rowsum ≡ 1, so Q, K and the mask do not affect the output).
    attn_concat = jnp.dot(pool_ref[...], v, preferred_element_type=jnp.float32)
    attn_out = jnp.dot(attn_concat, wfc_ref[...],
                       preferred_element_type=jnp.float32)   # fc_out (no bias)

    inv_e = jnp.float32(1.0 / EMBED)

    def layernorm(x, gamma, beta):
        # x has zeros in the padded columns; gamma/beta are zero there too, so
        # the padded columns of the result stay exactly zero.
        mu = jnp.sum(x, axis=-1, keepdims=True) * inv_e
        d = x - mu
        dm = d * lane_mask                                    # mask pad cols
        var = jnp.sum(dm * dm, axis=-1, keepdims=True) * inv_e
        return d * jax.lax.rsqrt(var + EPS) * gamma + beta

    # ---- residual + norm1 (+ dropout = identity) ----
    x1 = layernorm(attn_out + q, g1, be1)
    # TODO(synk): nn.Dropout treated as eval-mode identity (no RNG applied).

    # ---- FFN: Linear -> ReLU -> Linear ----
    h1 = jnp.dot(x1, w1_ref[...], preferred_element_type=jnp.float32) + b1
    h1 = jnp.maximum(h1, 0.0)
    ffn = jnp.dot(h1, w2_ref[...], preferred_element_type=jnp.float32) + b2

    # ---- residual + norm2 (+ dropout = identity) ----
    out_ref[...] = layernorm(ffn + x1, g2, be2)


@jax.jit
def transformer_block(q, k, v, mask, params):
    # `k` and `mask` are accepted for API parity with the PyTorch module, but
    # the reference forward's output is mathematically independent of them
    # (softmax rows sum to 1 and the einsum contracts k/l independently), so
    # they are not DMA'd into the kernel.
    del k, mask
    wfc, w1, b1, w2, b2, g1, be1, g2, be2 = params
    N, S, E = q.shape
    nt = N * S

    def padw(x, rows, cols):
        return jnp.pad(x, ((0, rows - x.shape[0]), (0, cols - x.shape[1])))

    # Lane-dense activations / weights (zero padding keeps the math exact).
    q_flat = padw(q.reshape(nt, E), nt, EP)
    v_flat = padw(v.reshape(nt, E), nt, EP)
    wfc_p = padw(wfc, EP, EP)
    w1_p = padw(w1, EP, FFN_HIDDEN)
    w2_p = padw(w2, FFN_HIDDEN, EP)

    # Pack the six tiny vectors + lane mask into one (8, EP) array.
    lane_mask = (jnp.arange(EP) < E).astype(jnp.float32)[None, :]
    vecs = jnp.concatenate(
        [padw(b1, 1, EP), padw(b2, 1, EP),
         padw(g1, 1, EP), padw(be1, 1, EP),
         padw(g2, 1, EP), padw(be2, 1, EP),
         lane_mask, jnp.zeros((1, EP), jnp.float32)], axis=0)

    # Block-diagonal per-batch pooling matrix (segment-sum over the sequence).
    tok = jnp.arange(nt)
    pool = (tok[:, None] // S == tok[None, :] // S).astype(jnp.float32)

    out_pad = pl.pallas_call(
        transformer_block_kernel,
        out_shape=jax.ShapeDtypeStruct((nt, EP), jnp.float32),
        grid=(1,),
        in_specs=[
            pl.BlockSpec((nt, EP), lambda i: (0, 0)),    # q
            pl.BlockSpec((nt, EP), lambda i: (0, 0)),    # v
            pl.BlockSpec((nt, nt), lambda i: (0, 0)),    # pool
            pl.BlockSpec((EP, EP), lambda i: (0, 0)),    # fc_out weight
            pl.BlockSpec((EP, EP), lambda i: (0, 0)),    # FFN[0] weight
            pl.BlockSpec((EP, EP), lambda i: (0, 0)),    # FFN[2] weight
            pl.BlockSpec((8, EP), lambda i: (0, 0)),     # packed vectors
        ],
        out_specs=pl.BlockSpec((nt, EP), lambda i: (0, 0)),
    )(q_flat, v_flat, pool, wfc_p, w1_p, w2_p, vecs)

    return out_pad[:, :E].reshape(N, S, E)


if __name__ == "__main__":
    key = jax.random.PRNGKey(0)
    ks = jax.random.split(key, 8)

    q = jax.random.normal(ks[0], (BATCH, SEQ, EMBED), jnp.float32)
    k = jax.random.normal(ks[1], (BATCH, SEQ, EMBED), jnp.float32)
    v = jax.random.normal(ks[2], (BATCH, SEQ, EMBED), jnp.float32)
    # Causal mask, broadcast per batch (1 = keep, 0 = fill with -1e20).
    mask = jnp.broadcast_to(jnp.tril(jnp.ones((SEQ, SEQ), jnp.float32)),
                            (BATCH, SEQ, SEQ))

    # Deterministic synthetic parameters (weights stored as [in, out]).
    wfc = 0.05 * jax.random.normal(ks[3], (EMBED, EMBED), jnp.float32)      # fc_out
    w1 = 0.05 * jax.random.normal(ks[4], (EMBED, FFN_HIDDEN), jnp.float32)  # FFN[0]
    b1 = 0.05 * jax.random.normal(ks[5], (1, FFN_HIDDEN), jnp.float32)
    w2 = 0.05 * jax.random.normal(ks[6], (FFN_HIDDEN, EMBED), jnp.float32)  # FFN[2]
    b2 = 0.05 * jax.random.normal(ks[7], (1, EMBED), jnp.float32)
    g1 = jnp.ones((1, EMBED), jnp.float32)
    be1 = jnp.zeros((1, EMBED), jnp.float32)
    g2 = jnp.ones((1, EMBED), jnp.float32)
    be2 = jnp.zeros((1, EMBED), jnp.float32)

    params = (wfc, w1, b1, w2, b2, g1, be1, g2, be2)

    out = transformer_block(q, k, v, mask, params)
    jax.block_until_ready(out)
    assert out.shape == (BATCH, SEQ, EMBED)
    print("KERNEL_OK")
</pallas_src>

<mosaic_0001>
module attributes {stable_mosaic.version = 11 : i64} {
  func.func @transformer_block_kernel(%arg0: i32, %arg1: memref<16x128xf32, #tpu.memory_space<vmem>>, %arg2: memref<16x128xf32, #tpu.memory_space<vmem>>, %arg3: memref<16x16xf32, #tpu.memory_space<vmem>>, %arg4: memref<128x128xf32, #tpu.memory_space<vmem>>, %arg5: memref<128x128xf32, #tpu.memory_space<vmem>>, %arg6: memref<128x128xf32, #tpu.memory_space<vmem>>, %arg7: memref<8x128xf32, #tpu.memory_space<vmem>>, %arg8: memref<16x128xf32, #tpu.memory_space<vmem>>) attributes {dimension_semantics = [#tpu.dimension_semantics<arbitrary>], iteration_bounds = array<i64: 1>, scalar_prefetch = 0 : i64, scratch_operands = 0 : i64, tpu.core_type = #tpu.core_type<tc>, window_params = [{pipeline_mode = #tpu.pipeline_mode<synchronous>, transform_indices = @transform_0, window_bounds = array<i64: 16, 128>}, {pipeline_mode = #tpu.pipeline_mode<synchronous>, transform_indices = @transform_1, window_bounds = array<i64: 16, 128>}, {pipeline_mode = #tpu.pipeline_mode<synchronous>, transform_indices = @transform_2, window_bounds = array<i64: 16, 16>}, {pipeline_mode = #tpu.pipeline_mode<synchronous>, transform_indices = @transform_3, window_bounds = array<i64: 128, 128>}, {pipeline_mode = #tpu.pipeline_mode<synchronous>, transform_indices = @transform_4, window_bounds = array<i64: 128, 128>}, {pipeline_mode = #tpu.pipeline_mode<synchronous>, transform_indices = @transform_5, window_bounds = array<i64: 128, 128>}, {pipeline_mode = #tpu.pipeline_mode<synchronous>, transform_indices = @transform_6, window_bounds = array<i64: 8, 128>}, {pipeline_mode = #tpu.pipeline_mode<synchronous>, transform_indices = @transform_7, window_bounds = array<i64: 16, 128>}]} {
    %c0 = arith.constant 0 : index
    %c0_0 = arith.constant 0 : index
    %0 = vector.load %arg1[%c0, %c0_0] : memref<16x128xf32, #tpu.memory_space<vmem>>, vector<16x128xf32>
    %c0_1 = arith.constant 0 : index
    %c0_2 = arith.constant 0 : index
    %1 = vector.load %arg2[%c0_1, %c0_2] : memref<16x128xf32, #tpu.memory_space<vmem>>, vector<16x128xf32>
    %c0_3 = arith.constant 0 : index
    %c0_4 = arith.constant 0 : index
    %2 = vector.load %arg7[%c0_3, %c0_4] : memref<8x128xf32, #tpu.memory_space<vmem>>, vector<8x128xf32>
    %3 = vector.extract_strided_slice %2 {offsets = [0, 0], sizes = [1, 128], strides = [1, 1]} : vector<8x128xf32> to vector<1x128xf32>
    %4 = vector.extract_strided_slice %2 {offsets = [1, 0], sizes = [1, 128], strides = [1, 1]} : vector<8x128xf32> to vector<1x128xf32>
    %5 = vector.extract_strided_slice %2 {offsets = [2, 0], sizes = [1, 128], strides = [1, 1]} : vector<8x128xf32> to vector<1x128xf32>
    %6 = vector.extract_strided_slice %2 {offsets = [3, 0], sizes = [1, 128], strides = [1, 1]} : vector<8x128xf32> to vector<1x128xf32>
    %7 = vector.extract_strided_slice %2 {offsets = [4, 0], sizes = [1, 128], strides = [1, 1]} : vector<8x128xf32> to vector<1x128xf32>
    %8 = vector.extract_strided_slice %2 {offsets = [5, 0], sizes = [1, 128], strides = [1, 1]} : vector<8x128xf32> to vector<1x128xf32>
    %9 = vector.extract_strided_slice %2 {offsets = [6, 0], sizes = [1, 128], strides = [1, 1]} : vector<8x128xf32> to vector<1x128xf32>
    %c0_5 = arith.constant 0 : index
    %c0_6 = arith.constant 0 : index
    %10 = vector.load %arg3[%c0_5, %c0_6] : memref<16x16xf32, #tpu.memory_space<vmem>>, vector<16x16xf32>
    %cst = arith.constant dense<0.000000e+00> : vector<16x128xf32>
    %11 = tpu.matmul %10, %1, %cst {dimension_numbers = #tpu.dot_dimension_numbers<[1], [0], [0], [1], [0, 0, 1, 1], [], []>} : vector<16x16xf32>, vector<16x128xf32>, vector<16x128xf32> -> vector<16x128xf32>
    %c0_7 = arith.constant 0 : index
    %c0_8 = arith.constant 0 : index
    %12 = vector.load %arg4[%c0_7, %c0_8] : memref<128x128xf32, #tpu.memory_space<vmem>>, vector<128x128xf32>
    %cst_9 = arith.constant dense<0.000000e+00> : vector<16x128xf32>
    %13 = tpu.matmul %11, %12, %cst_9 {dimension_numbers = #tpu.dot_dimension_numbers<[1], [0], [0], [1], [0, 0, 1, 1], [], []>} : vector<16x128xf32>, vector<128x128xf32>, vector<16x128xf32> -> vector<16x128xf32>
    %14 = arith.addf %13, %0 : vector<16x128xf32>
    %cst_10 = arith.constant dense<0.000000e+00> : vector<16xf32>
    %15 = vector.multi_reduction <add>, %14, %cst_10 [1] : vector<16x128xf32> to vector<16xf32>
    %16 = vector.shape_cast %15 : vector<16xf32> to vector<16x1xf32>
    %cst_11 = arith.constant 3.125000e-02 : f32
    %17 = vector.broadcast %cst_11 : f32 to vector<16x1xf32>
    %18 = arith.mulf %16, %17 : vector<16x1xf32>
    %19 = vector.broadcast %18 : vector<16x1xf32> to vector<16x128xf32>
    %20 = arith.subf %14, %19 : vector<16x128xf32>
    %21 = vector.broadcast %9 : vector<1x128xf32> to vector<16x128xf32>
    %22 = arith.mulf %20, %21 : vector<16x128xf32>
    %23 = arith.mulf %22, %22 : vector<16x128xf32>
    %cst_12 = arith.constant dense<0.000000e+00> : vector<16xf32>
    %24 = vector.multi_reduction <add>, %23, %cst_12 [1] : vector<16x128xf32> to vector<16xf32>
    %25 = vector.shape_cast %24 : vector<16xf32> to vector<16x1xf32>
    %cst_13 = arith.constant 3.125000e-02 : f32
    %26 = vector.broadcast %cst_13 : f32 to vector<16x1xf32>
    %27 = arith.mulf %25, %26 : vector<16x1xf32>
    %cst_14 = arith.constant 9.99999974E-6 : f32
    %28 = vector.broadcast %cst_14 : f32 to vector<16x1xf32>
    %29 = arith.addf %27, %28 : vector<16x1xf32>
    %30 = math.rsqrt %29 : vector<16x1xf32>
    %31 = vector.broadcast %30 : vector<16x1xf32> to vector<16x128xf32>
    %32 = arith.mulf %20, %31 : vector<16x128xf32>
    %33 = vector.broadcast %5 : vector<1x128xf32> to vector<16x128xf32>
    %34 = arith.mulf %32, %33 : vector<16x128xf32>
    %35 = vector.broadcast %6 : vector<1x128xf32> to vector<16x128xf32>
    %36 = arith.addf %34, %35 : vector<16x128xf32>
    %c0_15 = arith.constant 0 : index
    %c0_16 = arith.constant 0 : index
    %37 = vector.load %arg5[%c0_15, %c0_16] : memref<128x128xf32, #tpu.memory_space<vmem>>, vector<128x128xf32>
    %cst_17 = arith.constant dense<0.000000e+00> : vector<16x128xf32>
    %38 = tpu.matmul %36, %37, %cst_17 {dimension_numbers = #tpu.dot_dimension_numbers<[1], [0], [0], [1], [0, 0, 1, 1], [], []>} : vector<16x128xf32>, vector<128x128xf32>, vector<16x128xf32> -> vector<16x128xf32>
    %39 = vector.broadcast %3 : vector<1x128xf32> to vector<16x128xf32>
    %40 = arith.addf %38, %39 : vector<16x128xf32>
    %cst_18 = arith.constant 0.000000e+00 : f32
    %41 = vector.broadcast %cst_18 : f32 to vector<16x128xf32>
    %42 = arith.maximumf %40, %41 : vector<16x128xf32>
    %c0_19 = arith.constant 0 : index
    %c0_20 = arith.constant 0 : index
    %43 = vector.load %arg6[%c0_19, %c0_20] : memref<128x128xf32, #tpu.memory_space<vmem>>, vector<128x128xf32>
    %cst_21 = arith.constant dense<0.000000e+00> : vector<16x128xf32>
    %44 = tpu.matmul %42, %43, %cst_21 {dimension_numbers = #tpu.dot_dimension_numbers<[1], [0], [0], [1], [0, 0, 1, 1], [], []>} : vector<16x128xf32>, vector<128x128xf32>, vector<16x128xf32> -> vector<16x128xf32>
    %45 = vector.broadcast %4 : vector<1x128xf32> to vector<16x128xf32>
    %46 = arith.addf %44, %45 : vector<16x128xf32>
    %47 = arith.addf %46, %36 : vector<16x128xf32>
    %cst_22 = arith.constant dense<0.000000e+00> : vector<16xf32>
    %48 = vector.multi_reduction <add>, %47, %cst_22 [1] : vector<16x128xf32> to vector<16xf32>
    %49 = vector.shape_cast %48 : vector<16xf32> to vector<16x1xf32>
    %cst_23 = arith.constant 3.125000e-02 : f32
    %50 = vector.broadcast %cst_23 : f32 to vector<16x1xf32>
    %51 = arith.mulf %49, %50 : vector<16x1xf32>
    %52 = vector.broadcast %51 : vector<16x1xf32> to vector<16x128xf32>
    %53 = arith.subf %47, %52 : vector<16x128xf32>
    %54 = vector.broadcast %9 : vector<1x128xf32> to vector<16x128xf32>
    %55 = arith.mulf %53, %54 : vector<16x128xf32>
    %56 = arith.mulf %55, %55 : vector<16x128xf32>
    %cst_24 = arith.constant dense<0.000000e+00> : vector<16xf32>
    %57 = vector.multi_reduction <add>, %56, %cst_24 [1] : vector<16x128xf32> to vector<16xf32>
    %58 = vector.shape_cast %57 : vector<16xf32> to vector<16x1xf32>
    %cst_25 = arith.constant 3.125000e-02 : f32
    %59 = vector.broadcast %cst_25 : f32 to vector<16x1xf32>
    %60 = arith.mulf %58, %59 : vector<16x1xf32>
    %cst_26 = arith.constant 9.99999974E-6 : f32
    %61 = vector.broadcast %cst_26 : f32 to vector<16x1xf32>
    %62 = arith.addf %60, %61 : vector<16x1xf32>
    %63 = math.rsqrt %62 : vector<16x1xf32>
    %64 = vector.broadcast %63 : vector<16x1xf32> to vector<16x128xf32>
    %65 = arith.mulf %53, %64 : vector<16x128xf32>
    %66 = vector.broadcast %7 : vector<1x128xf32> to vector<16x128xf32>
    %67 = arith.mulf %65, %66 : vector<16x128xf32>
    %68 = vector.broadcast %8 : vector<1x128xf32> to vector<16x128xf32>
    %69 = arith.addf %67, %68 : vector<16x128xf32>
    %c0_27 = arith.constant 0 : index
    %c0_28 = arith.constant 0 : index
    %70 = vector.load %arg8[%c0_27, %c0_28] : memref<16x128xf32, #tpu.memory_space<vmem>>, vector<16x128xf32>
    tpu.vector_store %arg8[%c0_27, %c0_28], %69 {strides = array<i32>} : memref<16x128xf32, #tpu.memory_space<vmem>>, vector<16x128xf32>,
    return
  }
  func.func @transform_0(%arg0: i32) -> (i32, i32) {
    %c0_i32 = arith.constant 0 : i32
    %c0_i32_0 = arith.constant 0 : i32
    %c0_i32_1 = arith.constant 0 : i32
    return %c0_i32, %c0_i32_0 : i32, i32
  }
  func.func @transform_1(%arg0: i32) -> (i32, i32) {
    %c0_i32 = arith.constant 0 : i32
    %c0_i32_0 = arith.constant 0 : i32
    %c0_i32_1 = arith.constant 0 : i32
    return %c0_i32, %c0_i32_0 : i32, i32
  }
  func.func @transform_2(%arg0: i32) -> (i32, i32) {
    %c0_i32 = arith.constant 0 : i32
    %c0_i32_0 = arith.constant 0 : i32
    %c0_i32_1 = arith.constant 0 : i32
    return %c0_i32, %c0_i32_0 : i32, i32
  }
  func.func @transform_3(%arg0: i32) -> (i32, i32) {
    %c0_i32 = arith.constant 0 : i32
    %c0_i32_0 = arith.constant 0 : i32
    %c0_i32_1 = arith.constant 0 : i32
    return %c0_i32, %c0_i32_0 : i32, i32
  }
  func.func @transform_4(%arg0: i32) -> (i32, i32) {
    %c0_i32 = arith.constant 0 : i32
    %c0_i32_0 = arith.constant 0 : i32
    %c0_i32_1 = arith.constant 0 : i32
    return %c0_i32, %c0_i32_0 : i32, i32
  }
  func.func @transform_5(%arg0: i32) -> (i32, i32) {
    %c0_i32 = arith.constant 0 : i32
    %c0_i32_0 = arith.constant 0 : i32
    %c0_i32_1 = arith.constant 0 : i32
    return %c0_i32, %c0_i32_0 : i32, i32
  }
  func.func @transform_6(%arg0: i32) -> (i32, i32) {
    %c0_i32 = arith.constant 0 : i32
    %c0_i32_0 = arith.constant 0 : i32
    %c0_i32_1 = arith.constant 0 : i32
    return %c0_i32, %c0_i32_0 : i32, i32
  }
  func.func @transform_7(%arg0: i32) -> (i32, i32) {
    %c0_i32 = arith.constant 0 : i32
    %c0_i32_0 = arith.constant 0 : i32
    %c0_i32_1 = arith.constant 0 : i32
    return %c0_i32, %c0_i32_0 : i32, i32
  }
}

</mosaic_0001>

<bundles_post_ra>
// kernel: transformer_block.1
= control target key start
LH: loop header
LB: loop body
LE: loop exit
PB: predicated region body
PF: predicated region fallthrough
CT: control target
= control target key end

     0   :  { %vm33_vm0 = vcmask 130048   ;;  %v214_v43 = vlaneseq  ;;  %s1007_s1 = inlined_call_operand.vmem [shape: f32[16,128], index: 1, kind: input, shape index: {}]   ;;  %s1008_s2 = inlined_call_operand.vmem [shape: f32[16,16], index: 2, kind: input, shape index: {}]   ;;  %s1009_s3 = inlined_call_operand.vmem [shape: f32[128,128], index: 3, kind: input, shape index: {}]   ;;  %s1010_s0 = inlined_call_operand.vmem [shape: f32[16,128], index: 0, kind: input, shape index: {}]   ;;  %s1011_s4 = inlined_call_operand.vmem [shape: f32[128,128], index: 4, kind: input, shape index: {}]   ;;  %s1012_s6 = inlined_call_operand.vmem [shape: f32[8,128], index: 6, kind: input, shape index: {}]   ;;  %s1013_s5 = inlined_call_operand.vmem [shape: f32[128,128], index: 5, kind: input, shape index: {}]   ;;  %s1014_s7 = inlined_call_operand.vmem [shape: f32[16,128], index: 7, kind: output, shape index: {}]  }
   0x1   :  { %v28_v0 = vld [vmem:[%s1007_s1] sm:$0xff]  ;;  %v29_v1 = vld [vmem:[%s1007_s1 + $0x8] sm:$0xff]  ;;  %v117_v7 = vld [vmem:[%s1009_s3 + $0x10] sm:$0xff] }
   0x2   :  { %v31_v2 = vld [vmem:[%s1008_s2] sm:$0xff]  ;;  %v654_v3 = vpack.c.bf16 %v29_v1, %v28_v0  ;;  %v116_v5 = vld [vmem:[%s1009_s3 + $0x8] sm:$0xff]  ;;  %v118_v8 = vld [vmem:[%s1009_s3 + $0x18] sm:$0xff]  ;;  %v882_v44 = vshrl.u32 %v214_v43, 7 }
   0x3   :  { %546 = vmatprep.mubr.msk.f32.mxu0 %vm33_vm0, %v31_v2  ;;  %v115_v4 = vld [vmem:[%s1009_s3] sm:$0xff]  ;;  %v662_v9 = vpack.c.bf16 %v118_v8, %v117_v7  ;;  %v120_v11 = vld [vmem:[%s1009_s3 + $0x28] sm:$0xff]  ;;  %v121_v14 = vld [vmem:[%s1009_s3 + $0x30] sm:$0xff] }
   0x4   :  { %v658_v6 = vpack.c.bf16 %v116_v5, %v115_v4  ;;  %655 = vmatprep.subr.bf16.mxu0 %v654_v3  ;;  %v119_v10 = vld [vmem:[%s1009_s3 + $0x20] sm:$0xff]  ;;  %v32_v12 = vld [vmem:[%s1008_s2 + $0x8] sm:$0xff]  ;;  %v122_v15 = vld [vmem:[%s1009_s3 + $0x38] sm:$0xff]  ;;  %v216_v45 = vsub.s32 6, %v882_v44 }
   0x5   :  { %657 = vmatpush3.bf16.msra.mxu0 %v654_v3  ;;  %v666_v13 = vpack.c.bf16 %v120_v11, %v119_v10  ;;  %v670_v16 = vpack.c.bf16 %v122_v15, %v121_v14  ;;  %v123_v17 = vld [vmem:[%s1009_s3 + $0x40] sm:$0xff]  ;;  %v124_v18 = vld [vmem:[%s1009_s3 + $0x48] sm:$0xff]  ;;  %v125_v20 = vld [vmem:[%s1009_s3 + $0x50] sm:$0xff] }
   0x6   :  { %659 = vmatprep.subr.bf16.mxu1 %v658_v6  ;;  %v674_v19 = vpack.c.bf16 %v124_v18, %v123_v17  ;;  %v126_v21 = vld [vmem:[%s1009_s3 + $0x58] sm:$0xff]  ;;  %v127_v23 = vld [vmem:[%s1009_s3 + $0x60] sm:$0xff]  ;;  %v128_v24 = vld [vmem:[%s1009_s3 + $0x68] sm:$0xff] }
   0x7   :  { %661 = vmatpush3.bf16.msra.mxu1 %v658_v6  ;;  %v678_v22 = vpack.c.bf16 %v126_v21, %v125_v20  ;;  %v682_v25 = vpack.c.bf16 %v128_v24, %v127_v23  ;;  %v129_v26 = vld [vmem:[%s1009_s3 + $0x70] sm:$0xff]  ;;  %v130_v27 = vld [vmem:[%s1009_s3 + $0x78] sm:$0xff]  ;;  %v26_v31 = vld [vmem:[%s1010_s0] sm:$0xff] }
   0x8   :  { %663 = vmatprep.subr.bf16.mxu1 %v662_v9  ;;  %547 = vmatmul.mubr.msk.f32.vlgmr.msra.gmra.mrb[0].mxu0 %vm33_vm0, %v32_v12  ;;  %v686_v28 = vpack.c.bf16 %v130_v27, %v129_v26  ;;  %v27_v35 = vld [vmem:[%s1010_s0 + $0x8] sm:$0xff]  ;;  %v246_v37 = vld [vmem:[%s1011_s4] sm:$0xff]  ;;  %v248_v39 = vld [vmem:[%s1011_s4 + $0x10] sm:$0xff] }
   0x9   :  { %v247_v38 = vld [vmem:[%s1011_s4 + $0x8] sm:$0xff]  ;;  %v249_v41 = vld [vmem:[%s1011_s4 + $0x18] sm:$0xff]  ;;  %v888_v46 = vld [vmem:[%s1012_s6] sm:$0xff] }
   0xa   :  { %v690_v40 = vpack.c.bf16 %v247_v38, %v246_v37  ;;  %v694_v42 = vpack.c.bf16 %v249_v41, %v248_v39  ;;  %v891_v49 = vrot.slane %v888_v46, %v216_v45  ;;  %v250_v58 = vld [vmem:[%s1011_s4 + $0x20] sm:$0xff]  ;;  %v251_v59 = vld [vmem:[%s1011_s4 + $0x28] sm:$0xff]  ;;  %v252_v61 = vld [vmem:[%s1011_s4 + $0x30] sm:$0xff]  ;;  %v236_v39 = vsub.s32 2, %v882_v44 }
   0xb   :  { %665 = vmatpush3.bf16.msra.mxu1 %v662_v9  ;;  %v698_v60 = vpack.c.bf16 %v251_v59, %v250_v58  ;;  %v253_v62 = vld [vmem:[%s1011_s4 + $0x38] sm:$0xff]  ;;  %v254_v0 = vld [vmem:[%s1011_s4 + $0x40] sm:$0xff]  ;;  %v255_v1 = vld [vmem:[%s1011_s4 + $0x48] sm:$0xff]  ;;  %v264_v58 = vsub.s32 0, %v882_v44 }
   0xc   :  { %667 = vmatprep.subr.bf16.mxu1 %v666_v13  ;;  %691 = vmatprep.subr.bf16.mxu0 %v690_v40  ;;  %v702_v63 = vpack.c.bf16 %v253_v62, %v252_v61  ;;  %v706_v2 = vpack.c.bf16 %v255_v1, %v254_v0  ;;  %v256_v3 = vld [vmem:[%s1011_s4 + $0x50] sm:$0xff]  ;;  %v257_v4 = vld [vmem:[%s1011_s4 + $0x58] sm:$0xff]  ;;  %v258_v5 = vld [vmem:[%s1011_s4 + $0x60] sm:$0xff]  ;;  %v237_v41 = vrot.slane %v888_v46, %v236_v39  ;;  %v361_v1 = vsub.s32 1, %v882_v44 }
   0xd   :  { %693 = vmatpush3.bf16.msra.mxu0 %v690_v40  ;;  %v710_v6 = vpack.c.bf16 %v257_v4, %v256_v3  ;;  %v259_v7 = vld [vmem:[%s1011_s4 + $0x68] sm:$0xff]  ;;  %v260_v9 = vld [vmem:[%s1011_s4 + $0x70] sm:$0xff]  ;;  %v261_v10 = vld [vmem:[%s1011_s4 + $0x78] sm:$0xff]  ;;  %v242_v40 = vsub.s32 3, %v882_v44  ;;  %v265_v59 = vrot.slane %v888_v46, %v264_v58 }
   0xe   :  { %695 = vmatprep.subr.bf16.mxu0 %v694_v42  ;;  %v714_v8 = vpack.c.bf16 %v259_v7, %v258_v5  ;;  %v718_v11 = vpack.c.bf16 %v261_v10, %v260_v9  ;;  %v343_v12 = vld [vmem:[%s1013_s5] sm:$0xff]  ;;  %v345_v14 = vld [vmem:[%s1013_s5 + $0x10] sm:$0xff] }
   0xf   :  { %669 = vmatpush3.bf16.msra.mxu1 %v666_v13  ;;  %v344_v13 = vld [vmem:[%s1013_s5 + $0x8] sm:$0xff]  ;;  %v347_v18 = vld [vmem:[%s1013_s5 + $0x20] sm:$0xff]  ;;  %v349_v21 = vld [vmem:[%s1013_s5 + $0x30] sm:$0xff]  ;;  %v243_v45 = vrot.slane %v888_v46, %v242_v40 }
  0x10   :  { %671 = vmatprep.subr.bf16.mxu1 %v670_v16  ;;  %v722_v15 = vpack.c.bf16 %v344_v13, %v343_v12  ;;  %v351_v24 = vld [vmem:[%s1013_s5 + $0x40] sm:$0xff]  ;;  %v353_v27 = vld [vmem:[%s1013_s5 + $0x50] sm:$0xff] }
  0x11   :  { %697 = vmatpush3.bf16.msra.mxu0 %v694_v42 }
  0x12   :  { %699 = vmatprep.subr.bf16.mxu0 %v698_v60 }
  0x13   :  { %673 = vmatpush3.bf16.msra.mxu1 %v670_v16  ;;  %v346_v16 = vld [vmem:[%s1013_s5 + $0x18] sm:$0xff] }
  0x14   :  { %675 = vmatprep.subr.bf16.mxu1 %v674_v19  ;;  %v726_v17 = vpack.c.bf16 %v346_v16, %v345_v14 }
  0x15   :  { %701 = vmatpush3.bf16.msra.mxu0 %v698_v60 }
  0x16   :  { %703 = vmatprep.subr.bf16.mxu0 %v702_v63 }
  0x17   :  { %677 = vmatpush3.bf16.msra.mxu1 %v674_v19  ;;  %v348_v19 = vld [vmem:[%s1013_s5 + $0x28] sm:$0xff] }
  0x18   :  { %679 = vmatprep.subr.bf16.mxu1 %v678_v22  ;;  %v730_v20 = vpack.c.bf16 %v348_v19, %v347_v18 }
  0x19   :  { %705 = vmatpush3.bf16.msra.mxu0 %v702_v63 }
  0x1a   :  { %707 = vmatprep.subr.bf16.mxu0 %v706_v2 }
  0x1b   :  { %681 = vmatpush3.bf16.msra.mxu1 %v678_v22  ;;  %v350_v22 = vld [vmem:[%s1013_s5 + $0x38] sm:$0xff] }
  0x1c   :  { %683 = vmatprep.subr.bf16.mxu1 %v682_v25  ;;  %v734_v23 = vpack.c.bf16 %v350_v22, %v349_v21 }
  0x1d   :  { %709 = vmatpush3.bf16.msra.mxu0 %v706_v2  ;;  %v362_v2 = vrot.slane %v888_v46, %v361_v1 }
  0x1e   :  { %711 = vmatprep.subr.bf16.mxu0 %v710_v6 }
  0x1f   :  { %685 = vmatpush3.bf16.msra.mxu1 %v682_v25  ;;  %v352_v25 = vld [vmem:[%s1013_s5 + $0x48] sm:$0xff] }
  0x20   :  { %687 = vmatprep.subr.bf16.mxu1 %v686_v28  ;;  %v738_v26 = vpack.c.bf16 %v352_v25, %v351_v24  ;;  %v466_v25 = vsub.s32 4, %v882_v44 }
  0x21   :  { %713 = vmatpush3.bf16.msra.mxu0 %v710_v6 }
  0x22   :  { %715 = vmatprep.subr.bf16.mxu0 %v714_v8 }
  0x23   :  { %689 = vmatpush3.bf16.msra.mxu1 %v686_v28  ;;  %v354_v28 = vld [vmem:[%s1013_s5 + $0x58] sm:$0xff] }
  0x24   :  { %723 = vmatprep.subr.bf16.mxu1 %v722_v15 }
  0x25   :  { %717 = vmatpush3.bf16.msra.mxu0 %v714_v8 }
  0x26   :  { %719 = vmatprep.subr.bf16.mxu0 %v718_v11 }
  0x29   :  { %721 = vmatpush3.bf16.msra.mxu0 %v718_v11 }
  0xdb   :  { %v548_v29 = vpop.f32.mrb[0].mxu0 }
  0xdc   :  { %v106_v30 = vpop.f32.mrb[1].mxu0 }
  0xdd   :  { %581 = vmatprep.mubr.f32.mxu1 %v106_v30  ;;  %v355_v30 = vld [vmem:[%s1013_s5 + $0x60] sm:$0xff] }
  0xde   :  { %582 = vmatmul.mubr.f32.vlgmr.msra.gmra.mrb[0].mxu1 %v548_v29  ;;  %v742_v29 = vpack.c.bf16 %v354_v28, %v353_v27  ;;  %v467_v27 = vrot.slane %v888_v46, %v466_v25 }
  0xdf   :  { %725 = vmatpush3.bf16.msra.mxu1 %v722_v15 }
  0xe0   :  { %727 = vmatprep.subr.bf16.mxu1 %v726_v17 }
  0xe3   :  { %729 = vmatpush3.bf16.msra.mxu1 %v726_v17 }
  0xe4   :  { %731 = vmatprep.subr.bf16.mxu1 %v730_v20 }
  0xe7   :  { %733 = vmatpush3.bf16.msra.mxu1 %v730_v20 }
  0xe8   :  { %735 = vmatprep.subr.bf16.mxu1 %v734_v23 }
  0xeb   :  { %737 = vmatpush3.bf16.msra.mxu1 %v734_v23 }
  0xec   :  { %739 = vmatprep.subr.bf16.mxu1 %v738_v26 }
  0xef   :  { %741 = vmatpush3.bf16.msra.mxu1 %v738_v26  ;;  %v472_v26 = vsub.s32 5, %v882_v44 }
  0xf0   :  { %743 = vmatprep.subr.bf16.mxu1 %v742_v29 }
  0xf3   :  { %745 = vmatpush3.bf16.msra.mxu1 %v742_v29  ;;  %v473_v29 = vrot.slane %v888_v46, %v472_v26 }
 0x1b1   :  { %v583_v32 = vpop.f32.mrb[0].mxu1 }
 0x1b2   :  { %v197_v33 = vpop.f32.mrb[1].mxu1  ;;  %v203_v36 = vadd.f32 %v583_v32, %v27_v35 }
 0x1b3   :  { %v198_v34 = vadd.f32 %v197_v33, %v26_v31  ;;  %v356_v31 = vld [vmem:[%s1013_s5 + $0x68] sm:$0xff] }
 0x1b4   :  { %v746_v32 = vpack.c.bf16 %v356_v31, %v355_v30 }
 0x1b5   :  { %206 = vadd.xlane.f32.xlu0 %v198_v34 }
 0x1b6   :  { %747 = vmatprep.subr.bf16.mxu1 %v746_v32 }
 0x1b7   :  { %749 = vmatpush3.bf16.msra.mxu1 %v746_v32 }
 0x1b9   :  { %208 = vadd.xlane.f32.xlu0 %v203_v36 }
 0x242   :  { %v207_v47 = vpop.xlane.xlu0 %206 }
 0x243   :  { %v210_v48 = vmul.f32 0.03125, %v207_v47 }
 0x245   :  { %v893_v50 = vsub.f32 %v198_v34, %v210_v48 }
 0x246   :  { %v209_v51 = vpop.xlane.xlu0 %208 }
 0x247   :  { %v211_v52 = vmul.f32 0.03125, %v209_v51  ;;  %v218_v53 = vmul.f32 %v891_v49, %v893_v50 }
 0x249   :  { %v897_v54 = vsub.f32 %v203_v36, %v211_v52  ;;  %v220_v55 = vmul.f32 %v218_v53, %v218_v53 }
 0x24b   :  { %222 = vadd.xlane.f32.xlu1 %v220_v55  ;;  %v219_v56 = vmul.f32 %v891_v49, %v897_v54 }
 0x24d   :  { %v221_v57 = vmul.f32 %v219_v56, %v219_v56  ;;  %v357_v56 = vld [vmem:[%s1013_s5 + $0x70] sm:$0xff] }
 0x24f   :  { %224 = vadd.xlane.f32.xlu1 %v221_v57  ;;  %v358_v57 = vld [vmem:[%s1013_s5 + $0x78] sm:$0xff] }
 0x2d8   :  { %v223_v33 = vpop.xlane.xlu1 %222 }
 0x2d9   :  { %v226_v34 = vmul.f32 0.03125, %v223_v33 }
 0x2db   :  { %v228_v35 = vadd.f32 1e-05, %v226_v34 }
 0x2dc   :  { %v225_v36 = vpop.xlane.xlu1 %224 }
 0x2dd   :  { %754 = vrsqrt.f32 %v228_v35  ;;  %v227_v37 = vmul.f32 0.03125, %v225_v36 }
 0x2df   :  { %v229_v38 = vadd.f32 1e-05, %v227_v37 }
 0x2e1   :  { %756 = vrsqrt.f32 %v229_v38 }
 0x2e7   :  { %v755_v42 = vpop.eup %754 }
 0x2e8   :  { %v232_v43 = vmul.f32 %v755_v42, %v893_v50  ;;  %v750_v50 = vpack.c.bf16 %v358_v57, %v357_v56 }
 0x2ea   :  { %v238_v47 = vmul.f32 %v237_v41, %v232_v43  ;;  %751 = vmatprep.subr.bf16.mxu1 %v750_v50 }
 0x2eb   :  { %v757_v48 = vpop.eup %756  ;;  %753 = vmatpush3.bf16.msra.mxu1 %v750_v50 }
 0x2ec   :  { %v244_v51 = vadd.f32 %v243_v45, %v238_v47  ;;  %v233_v52 = vmul.f32 %v757_v48, %v897_v54 }
 0x2ee   :  { %616 = vmatprep.mubr.f32.mxu0 %v244_v51  ;;  %v239_v53 = vmul.f32 %v237_v41, %v233_v52 }
 0x2f0   :  { %v245_v55 = vadd.f32 %v243_v45, %v239_v53 }
 0x2f2   :  { %617 = vmatmul.mubr.f32.vlgmr.msra.gmra.mrb[2].mxu0 %v245_v55 }
 0x3c5   :  { %v618_v54 = vpop.f32.mrb[2].mxu0 }
 0x3c6   :  { %v338_v60 = vadd.f32 %v618_v54, %v265_v59  ;;  %v332_v61 = vpop.f32.mrb[3].mxu0 }
 0x3c7   :  { %v333_v62 = vadd.f32 %v332_v61, %v265_v59 }
 0x3c8   :  { %v342_v0 = vmax.f32 %v338_v60, 0.0 }
 0x3c9   :  { %v341_v63 = vmax.f32 %v333_v62, 0.0 }
 0x3cb   :  { %651 = vmatprep.mubr.f32.mxu1 %v341_v63 }
 0x3cc   :  { %652 = vmatmul.mubr.f32.vlgmr.msra.gmra.mrb[2].mxu1 %v342_v0 }
 0x49f   :  { %v653_v3 = vpop.f32.mrb[2].mxu1 }
 0x4a0   :  { %v435_v4 = vadd.f32 %v653_v3, %v362_v2  ;;  %v429_v5 = vpop.f32.mrb[3].mxu1 }
 0x4a1   :  { %v430_v6 = vadd.f32 %v429_v5, %v362_v2 }
 0x4a2   :  { %v439_v7 = vadd.f32 %v435_v4, %v245_v55 }
 0x4a3   :  { %v438_v8 = vadd.f32 %v430_v6, %v244_v51 }
 0x4a4   :  { %442 = vadd.xlane.f32.xlu1 %v439_v7 }
 0x4a5   :  { %440 = vadd.xlane.f32.xlu0 %v438_v8 }
 0x531   :  { %v443_v9 = vpop.xlane.xlu1 %442 }
 0x532   :  { %v445_v10 = vmul.f32 0.03125, %v443_v9  ;;  %v441_v11 = vpop.xlane.xlu0 %440 }
 0x533   :  { %v444_v12 = vmul.f32 0.03125, %v441_v11 }
 0x534   :  { %v447_v13 = vsub.f32 %v439_v7, %v445_v10 }
 0x535   :  { %v446_v14 = vsub.f32 %v438_v8, %v444_v12 }
 0x536   :  { %v449_v15 = vmul.f32 %v447_v13, %v891_v49 }
 0x537   :  { %v448_v16 = vmul.f32 %v446_v14, %v891_v49 }
 0x538   :  { %v451_v17 = vmul.f32 %v449_v15, %v449_v15 }
 0x539   :  { %v450_v18 = vmul.f32 %v448_v16, %v448_v16 }
 0x53a   :  { %454 = vadd.xlane.f32.xlu1 %v451_v17 }
 0x53b   :  { %452 = vadd.xlane.f32.xlu0 %v450_v18 }
 0x5c7   :  { %v455_v19 = vpop.xlane.xlu1 %454 }
 0x5c8   :  { %v457_v20 = vmul.f32 0.03125, %v455_v19  ;;  %v453_v21 = vpop.xlane.xlu0 %452 }
 0x5c9   :  { %v456_v22 = vmul.f32 0.03125, %v453_v21 }
 0x5ca   :  { %v459_v23 = vadd.f32 1e-05, %v457_v20 }
 0x5cb   :  { %v458_v24 = vadd.f32 1e-05, %v456_v22 }
 0x5cc   :  { %758 = vrsqrt.f32 %v459_v23 }
 0x5cd   :  { %760 = vrsqrt.f32 %v458_v24 }
 0x5d6   :  { %v759_v28 = vpop.eup %758 }
 0x5d7   :  { %v761_v49 = vpop.eup %760  ;;  %v463_v30 = vmul.f32 %v759_v28, %v447_v13 }
 0x5d8   :  { %v462_v31 = vmul.f32 %v761_v49, %v446_v14 }
 0x5d9   :  { %v469_v32 = vmul.f32 %v467_v27, %v463_v30 }
 0x5da   :  { %v468_v33 = vmul.f32 %v467_v27, %v462_v31 }
 0x5db   :  { %v475_v34 = vadd.f32 %v473_v29, %v469_v32 }
 0x5dc   :  { %v474_v35 = vadd.f32 %v473_v29, %v468_v33 }
 0x5dd   :  { %477 = vst [vmem:[%s1014_s7 + $0x8] sm:$0xff] %v475_v34 }
 0x5de   :  { %476 = vst [vmem:[%s1014_s7] sm:$0xff] %v474_v35 }

</bundles_post_ra>
